<compile_context>
chip_gen: v7x
topology: tpu7x:2x2x1
jax: 0.10.0
libtpu: 0.0.40
codegen_flags: <defaults>
</compile_context>

<pallas_src>
import functools

import jax
import jax.numpy as jnp
from jax import lax
from jax.experimental import pallas as pl
from jax.experimental.pallas import tpu as pltpu

NUM_FEATURES = 35                 # module-level constant from aednet.py
BN_EPS = 1e-5
ROW_TILE = 512                    # >=512-row tiles: ~85% of HBM roofline
VMEM_LIMIT = 32 * 1024 * 1024     # explicit; fits v7x scoped VMEM


def _round_up(x, m):
    return (x + m - 1) // m * m


# ----------------------------------------------------------------------------
# NUMERICAL path
# ----------------------------------------------------------------------------
def _linear_rows(x, wt_ref, b_ref):
    # y = x @ W^T + b with K=3 done as three VPU broadcast FMAs (no MXU).
    return (x[:, 0:1] * wt_ref[0:1, :]
            + x[:, 1:2] * wt_ref[1:2, :]
            + x[:, 2:3] * wt_ref[2:3, :]
            + b_ref[...])


def _bn_stats_kernel(x_ref, wt_ref, b_ref, gamma_ref, beta_ref, ss_ref,
                     acc_ref, *, n_rows):
    i = pl.program_id(0)
    tile = x_ref.shape[0]

    @pl.when(i == 0)
    def _():
        acc_ref[...] = jnp.zeros_like(acc_ref)

    y = _linear_rows(x_ref[...], wt_ref, b_ref)                # (tile, H)
    if n_rows % tile != 0:
        # mask rows added by padding N up to a multiple of the tile size
        row = i * tile + lax.broadcasted_iota(jnp.int32, (tile, 1), 0)
        y = jnp.where(row < n_rows, y, 0.0)

    acc_ref[0:1, :] += jnp.sum(y, axis=0, keepdims=True)       # sum
    acc_ref[1:2, :] += jnp.sum(y * y, axis=0, keepdims=True)   # sum of squares

    @pl.when(i == pl.num_programs(0) - 1)
    def _():
        inv_n = 1.0 / n_rows
        mean = acc_ref[0:1, :] * inv_n
        var = acc_ref[1:2, :] * inv_n - mean * mean            # biased variance
        scale = gamma_ref[...] * lax.rsqrt(var + BN_EPS)
        ss_ref[0:1, :] = scale
        ss_ref[1:2, :] = beta_ref[...] - mean * scale


def _bn_apply_kernel(x_ref, wt_ref, b_ref, ss_ref, o_ref):
    y = _linear_rows(x_ref[...], wt_ref, b_ref)
    z = y * ss_ref[0:1, :] + ss_ref[1:2, :]                    # folded BN affine
    o_ref[...] = jnp.where(z > 0, z, jnp.expm1(z))             # ELU, alpha = 1


def project_numerical(x, w, b, gamma, beta):
    """x: (N, 3) f32; w: (h_dim, 3); b/gamma/beta: (h_dim,). -> (N, h_dim)."""
    n = x.shape[0]
    h_dim = w.shape[0]
    tile = min(ROW_TILE, _round_up(n, 8))
    n_pad = _round_up(n, tile)
    if n_pad != n:
        x = jnp.pad(x, ((0, n_pad - n), (0, 0)))
    n_tiles = n_pad // tile

    wt = jnp.transpose(w).astype(jnp.float32)                  # (3, h_dim)
    b2 = b.reshape(1, h_dim).astype(jnp.float32)
    g2 = gamma.reshape(1, h_dim).astype(jnp.float32)
    be2 = beta.reshape(1, h_dim).astype(jnp.float32)

    x_spec = pl.BlockSpec((tile, 3), lambda i: (i, 0))
    const = lambda shape: pl.BlockSpec(shape, lambda i: (0, 0))  # VMEM-resident

    # Pass 1: full-batch statistics -> folded (scale, shift), shape (2, h_dim).
    scale_shift = pl.pallas_call(
        functools.partial(_bn_stats_kernel, n_rows=n),
        out_shape=jax.ShapeDtypeStruct((2, h_dim), jnp.float32),
        grid=(n_tiles,),
        in_specs=[x_spec, const((3, h_dim)), const((1, h_dim)),
                  const((1, h_dim)), const((1, h_dim))],
        out_specs=const((2, h_dim)),
        scratch_shapes=[pltpu.VMEM((2, h_dim), jnp.float32)],
        compiler_params=pltpu.CompilerParams(
            dimension_semantics=("arbitrary",),                # reduction axis
            vmem_limit_bytes=VMEM_LIMIT),
    )(x, wt, b2, g2, be2)

    # Pass 2: normalize + ELU, independent per row tile.
    out = pl.pallas_call(
        _bn_apply_kernel,
        out_shape=jax.ShapeDtypeStruct((n_pad, h_dim), jnp.float32),
        grid=(n_tiles,),
        in_specs=[x_spec, const((3, h_dim)), const((1, h_dim)),
                  const((2, h_dim))],
        out_specs=pl.BlockSpec((tile, h_dim), lambda i: (i, 0)),
        compiler_params=pltpu.CompilerParams(
            dimension_semantics=("parallel",),                 # megacore on v7x
            vmem_limit_bytes=VMEM_LIMIT),
    )(x, wt, b2, scale_shift)

    return out[:n] if n_pad != n else out


# ----------------------------------------------------------------------------
# CATEGORICAL path
# ----------------------------------------------------------------------------
def _embed_kernel(idx_ref, table_ref, o_ref):
    idx = idx_ref[...]                                         # (tile, 1) i32
    tile = idx_ref.shape[0]
    vocab = table_ref.shape[0]
    col = lax.broadcasted_iota(jnp.int32, (tile, vocab), 1)
    onehot = (col == idx).astype(jnp.float32)                  # (tile, V)
    # gather-as-matmul on the MXU; the table block is resident in VMEM
    o_ref[...] = jnp.dot(onehot, table_ref[...],
                         preferred_element_type=jnp.float32)


def project_categorical(x_ids, table):
    """x_ids: (B, L) ints in [0, num_features]; table: (V, h_dim) f32."""
    bsz, seq = x_ids.shape
    vocab, h_dim = table.shape
    m = bsz * seq
    tile = min(ROW_TILE, _round_up(m, 8))
    m_pad = _round_up(m, tile)
    idx = x_ids.reshape(m).astype(jnp.int32)
    if m_pad != m:
        idx = jnp.pad(idx, (0, m_pad - m))       # padded rows sliced off below
    idx2 = idx.reshape(m_pad, 1)
    # TODO(synk): the (tile, 1) i32 id block wastes 127/128 lanes; move ids to
    # SMEM (PrefetchScalarGridSpec) + pl.Element row-gather if h_dim grows
    # large enough (>=512) for DMA gather to beat the one-hot matmul.

    out = pl.pallas_call(
        _embed_kernel,
        out_shape=jax.ShapeDtypeStruct((m_pad, h_dim), jnp.float32),
        grid=(m_pad // tile,),
        in_specs=[pl.BlockSpec((tile, 1), lambda i: (i, 0)),
                  pl.BlockSpec((vocab, h_dim), lambda i: (0, 0))],  # resident
        out_specs=pl.BlockSpec((tile, h_dim), lambda i: (i, 0)),
        compiler_params=pltpu.CompilerParams(
            dimension_semantics=("parallel",),
            vmem_limit_bytes=VMEM_LIMIT),
    )(idx2, table.astype(jnp.float32))
    return out[:m].reshape(bsz, seq, h_dim)


# ----------------------------------------------------------------------------
# ProjectLayer wrapper (deterministic synthetic parameters).
# ----------------------------------------------------------------------------
def make_project_layer(feature_type, num_features, h_dim, key):
    if feature_type == "categorical":
        table = jax.random.normal(key, (num_features + 1, h_dim), jnp.float32)
        params = {"table": table}
        return params, lambda x_ids: project_categorical(x_ids, params["table"])

    if feature_type == "numerical":
        k_w, k_b = jax.random.split(key, 2)
        fan_in = 3
        bound = 1.0 / (fan_in ** 0.5)
        w = jax.random.uniform(k_w, (h_dim, fan_in), jnp.float32, -bound, bound)
        b = jax.random.uniform(k_b, (h_dim,), jnp.float32, -bound, bound)
        gamma = jnp.ones((h_dim,), jnp.float32)   # BatchNorm1d default init
        beta = jnp.zeros((h_dim,), jnp.float32)
        params = {"w": w, "b": b, "gamma": gamma, "beta": beta}
        return params, lambda x: project_numerical(
            x, params["w"], params["b"], params["gamma"], params["beta"])

    # FeatureType.NONE: forward returns None
    return {}, (lambda x: None)


# ----------------------------------------------------------------------------
# Pure-JAX references for sanity checking.
# ----------------------------------------------------------------------------
def _ref_numerical(x, w, b, gamma, beta):
    y = jnp.dot(x, w.T, precision=lax.Precision.HIGHEST) + b
    mean = jnp.mean(y, axis=0, keepdims=True)
    var = jnp.mean((y - mean) ** 2, axis=0, keepdims=True)
    z = gamma * (y - mean) * lax.rsqrt(var + BN_EPS) + beta
    return jnp.where(z > 0, z, jnp.expm1(z))


def _ref_categorical(x_ids, table):
    return table[x_ids]


if __name__ == "__main__":
    key = jax.random.PRNGKey(0)
    k_num, k_cat, k_xn, k_xc = jax.random.split(key, 4)

    h_dim = 32
    batch = 8            # N rows for the numerical path (BatchNorm over batch)
    b_cat, l_cat = 2, 8  # (batch, seq) of categorical ids

    # NUMERICAL path: x is (N, 3)
    x_num = jax.random.normal(k_xn, (batch, 3), jnp.float32)
    num_params, numerical_layer = make_project_layer(
        "numerical", NUM_FEATURES, h_dim, k_num)
    y_num = numerical_layer(x_num)
    jax.block_until_ready(y_num)
    assert y_num.shape == (batch, h_dim)
    y_num_ref = _ref_numerical(x_num, num_params["w"], num_params["b"],
                               num_params["gamma"], num_params["beta"])
    assert bool(jnp.allclose(y_num, y_num_ref, rtol=1e-2, atol=1e-2))

    # CATEGORICAL path: x is (B, L) int ids in [0, NUM_FEATURES]
    x_cat = jax.random.randint(k_xc, (b_cat, l_cat), 0, NUM_FEATURES + 1,
                               jnp.int32)
    cat_params, categorical_layer = make_project_layer(
        "categorical", NUM_FEATURES, h_dim, k_cat)
    y_cat = categorical_layer(x_cat)
    jax.block_until_ready(y_cat)
    assert y_cat.shape == (b_cat, l_cat, h_dim)
    y_cat_ref = _ref_categorical(x_cat, cat_params["table"])
    assert bool(jnp.allclose(y_cat, y_cat_ref, rtol=1e-2, atol=1e-2))

    # NONE path
    _, none_layer = make_project_layer("none", NUM_FEATURES, h_dim, key)
    assert none_layer(x_num) is None

    print("KERNEL_OK")
</pallas_src>

<mosaic_0001>
module attributes {stable_mosaic.version = 11 : i64} {
  func.func @_bn_stats_kernel(%arg0: i32, %arg1: memref<8x3xf32, #tpu.memory_space<vmem>>, %arg2: memref<3x32xf32, #tpu.memory_space<vmem>>, %arg3: memref<1x32xf32, #tpu.memory_space<vmem>>, %arg4: memref<1x32xf32, #tpu.memory_space<vmem>>, %arg5: memref<1x32xf32, #tpu.memory_space<vmem>>, %arg6: memref<2x32xf32, #tpu.memory_space<vmem>>, %arg7: memref<2x32xf32, #tpu.memory_space<vmem>>) attributes {dimension_semantics = [#tpu.dimension_semantics<arbitrary>], iteration_bounds = array<i64: 1>, scalar_prefetch = 0 : i64, scratch_operands = 1 : i64, tpu.core_type = #tpu.core_type<tc>, window_params = [{transform_indices = @transform_0, window_bounds = array<i64: 8, 3>}, {pipeline_mode = #tpu.pipeline_mode<synchronous>, transform_indices = @transform_1, window_bounds = array<i64: 3, 32>}, {pipeline_mode = #tpu.pipeline_mode<synchronous>, transform_indices = @transform_2, window_bounds = array<i64: 1, 32>}, {pipeline_mode = #tpu.pipeline_mode<synchronous>, transform_indices = @transform_3, window_bounds = array<i64: 1, 32>}, {pipeline_mode = #tpu.pipeline_mode<synchronous>, transform_indices = @transform_4, window_bounds = array<i64: 1, 32>}, {pipeline_mode = #tpu.pipeline_mode<synchronous>, transform_indices = @transform_5, window_bounds = array<i64: 2, 32>}]} {
    %c0_i32 = arith.constant 0 : i32
    %0 = arith.cmpi eq, %arg0, %c0_i32 : i32
    %1 = arith.extui %0 : i1 to i32
    %c0_i32_0 = arith.constant 0 : i32
    %2 = arith.cmpi ne, %1, %c0_i32_0 : i32
    scf.if %2 {
      %cst_19 = arith.constant 0.000000e+00 : f32
      %38 = vector.broadcast %cst_19 : f32 to vector<2x32xf32>
      %c0_20 = arith.constant 0 : index
      %c0_21 = arith.constant 0 : index
      %39 = vector.load %arg7[%c0_20, %c0_21] : memref<2x32xf32, #tpu.memory_space<vmem>>, vector<2x32xf32>
      tpu.vector_store %arg7[%c0_20, %c0_21], %38 {strides = array<i32>} : memref<2x32xf32, #tpu.memory_space<vmem>>, vector<2x32xf32>,
    } else {
    }
    %c0 = arith.constant 0 : index
    %c0_1 = arith.constant 0 : index
    %3 = vector.load %arg1[%c0, %c0_1] : memref<8x3xf32, #tpu.memory_space<vmem>>, vector<8x3xf32>
    %4 = vector.extract_strided_slice %3 {offsets = [0, 0], sizes = [8, 1], strides = [1, 1]} : vector<8x3xf32> to vector<8x1xf32>
    %c0_2 = arith.constant 0 : index
    %c0_3 = arith.constant 0 : index
    %5 = vector.load %arg2[%c0_2, %c0_3] : memref<3x32xf32, #tpu.memory_space<vmem>>, vector<1x32xf32>
    %6 = vector.broadcast %4 : vector<8x1xf32> to vector<8x32xf32>
    %7 = vector.broadcast %5 : vector<1x32xf32> to vector<8x32xf32>
    %8 = arith.mulf %6, %7 : vector<8x32xf32>
    %9 = vector.extract_strided_slice %3 {offsets = [0, 1], sizes = [8, 1], strides = [1, 1]} : vector<8x3xf32> to vector<8x1xf32>
    %c1 = arith.constant 1 : index
    %c0_4 = arith.constant 0 : index
    %10 = vector.load %arg2[%c1, %c0_4] : memref<3x32xf32, #tpu.memory_space<vmem>>, vector<1x32xf32>
    %11 = vector.broadcast %9 : vector<8x1xf32> to vector<8x32xf32>
    %12 = vector.broadcast %10 : vector<1x32xf32> to vector<8x32xf32>
    %13 = arith.mulf %11, %12 : vector<8x32xf32>
    %14 = arith.addf %8, %13 : vector<8x32xf32>
    %15 = vector.extract_strided_slice %3 {offsets = [0, 2], sizes = [8, 1], strides = [1, 1]} : vector<8x3xf32> to vector<8x1xf32>
    %c2 = arith.constant 2 : index
    %c0_5 = arith.constant 0 : index
    %16 = vector.load %arg2[%c2, %c0_5] : memref<3x32xf32, #tpu.memory_space<vmem>>, vector<1x32xf32>
    %17 = vector.broadcast %15 : vector<8x1xf32> to vector<8x32xf32>
    %18 = vector.broadcast %16 : vector<1x32xf32> to vector<8x32xf32>
    %19 = arith.mulf %17, %18 : vector<8x32xf32>
    %20 = arith.addf %14, %19 : vector<8x32xf32>
    %c0_6 = arith.constant 0 : index
    %c0_7 = arith.constant 0 : index
    %21 = vector.load %arg3[%c0_6, %c0_7] : memref<1x32xf32, #tpu.memory_space<vmem>>, vector<1x32xf32>
    %22 = vector.broadcast %21 : vector<1x32xf32> to vector<8x32xf32>
    %23 = arith.addf %20, %22 : vector<8x32xf32>
    %c0_8 = arith.constant 0 : index
    %c0_9 = arith.constant 0 : index
    %24 = vector.load %arg7[%c0_8, %c0_9] : memref<2x32xf32, #tpu.memory_space<vmem>>, vector<1x32xf32>
    %cst = arith.constant dense<0.000000e+00> : vector<32xf32>
    %25 = vector.multi_reduction <add>, %23, %cst [0] : vector<8x32xf32> to vector<32xf32>
    %26 = vector.shape_cast %25 : vector<32xf32> to vector<1x32xf32>
    %27 = arith.addf %24, %26 : vector<1x32xf32>
    %c0_10 = arith.constant 0 : index
    %c0_11 = arith.constant 0 : index
    %28 = vector.load %arg7[%c0_10, %c0_11] : memref<2x32xf32, #tpu.memory_space<vmem>>, vector<1x32xf32>
    tpu.vector_store %arg7[%c0_10, %c0_11], %27 {strides = array<i32>} : memref<2x32xf32, #tpu.memory_space<vmem>>, vector<1x32xf32>,
    %c1_12 = arith.constant 1 : index
    %c0_13 = arith.constant 0 : index
    %29 = vector.load %arg7[%c1_12, %c0_13] : memref<2x32xf32, #tpu.memory_space<vmem>>, vector<1x32xf32>
    %30 = arith.mulf %23, %23 : vector<8x32xf32>
    %cst_14 = arith.constant dense<0.000000e+00> : vector<32xf32>
    %31 = vector.multi_reduction <add>, %30, %cst_14 [0] : vector<8x32xf32> to vector<32xf32>
    %32 = vector.shape_cast %31 : vector<32xf32> to vector<1x32xf32>
    %33 = arith.addf %29, %32 : vector<1x32xf32>
    %c1_15 = arith.constant 1 : index
    %c0_16 = arith.constant 0 : index
    %34 = vector.load %arg7[%c1_15, %c0_16] : memref<2x32xf32, #tpu.memory_space<vmem>>, vector<1x32xf32>
    tpu.vector_store %arg7[%c1_15, %c0_16], %33 {strides = array<i32>} : memref<2x32xf32, #tpu.memory_space<vmem>>, vector<1x32xf32>,
    %c0_i32_17 = arith.constant 0 : i32
    %35 = arith.cmpi eq, %arg0, %c0_i32_17 : i32
    %36 = arith.extui %35 : i1 to i32
    %c0_i32_18 = arith.constant 0 : i32
    %37 = arith.cmpi ne, %36, %c0_i32_18 : i32
    scf.if %37 {
      %c0_19 = arith.constant 0 : index
      %c0_20 = arith.constant 0 : index
      %38 = vector.load %arg7[%c0_19, %c0_20] : memref<2x32xf32, #tpu.memory_space<vmem>>, vector<1x32xf32>
      %cst_21 = arith.constant 1.250000e-01 : f32
      %39 = vector.broadcast %cst_21 : f32 to vector<1x32xf32>
      %40 = arith.mulf %38, %39 : vector<1x32xf32>
      %c1_22 = arith.constant 1 : index
      %c0_23 = arith.constant 0 : index
      %41 = vector.load %arg7[%c1_22, %c0_23] : memref<2x32xf32, #tpu.memory_space<vmem>>, vector<1x32xf32>
      %cst_24 = arith.constant 1.250000e-01 : f32
      %42 = vector.broadcast %cst_24 : f32 to vector<1x32xf32>
      %43 = arith.mulf %41, %42 : vector<1x32xf32>
      %44 = arith.mulf %40, %40 : vector<1x32xf32>
      %45 = arith.subf %43, %44 : vector<1x32xf32>
      %c0_25 = arith.constant 0 : index
      %c0_26 = arith.constant 0 : index
      %46 = vector.load %arg4[%c0_25, %c0_26] : memref<1x32xf32, #tpu.memory_space<vmem>>, vector<1x32xf32>
      %cst_27 = arith.constant 9.99999974E-6 : f32
      %47 = vector.broadcast %cst_27 : f32 to vector<1x32xf32>
      %48 = arith.addf %45, %47 : vector<1x32xf32>
      %49 = math.rsqrt %48 : vector<1x32xf32>
      %50 = arith.mulf %46, %49 : vector<1x32xf32>
      %c0_28 = arith.constant 0 : index
      %c0_29 = arith.constant 0 : index
      %51 = vector.load %arg6[%c0_28, %c0_29] : memref<2x32xf32, #tpu.memory_space<vmem>>, vector<1x32xf32>
      tpu.vector_store %arg6[%c0_28, %c0_29], %50 {strides = array<i32>} : memref<2x32xf32, #tpu.memory_space<vmem>>, vector<1x32xf32>,
      %c0_30 = arith.constant 0 : index
      %c0_31 = arith.constant 0 : index
      %52 = vector.load %arg5[%c0_30, %c0_31] : memref<1x32xf32, #tpu.memory_space<vmem>>, vector<1x32xf32>
      %53 = arith.mulf %40, %50 : vector<1x32xf32>
      %54 = arith.subf %52, %53 : vector<1x32xf32>
      %c1_32 = arith.constant 1 : index
      %c0_33 = arith.constant 0 : index
      %55 = vector.load %arg6[%c1_32, %c0_33] : memref<2x32xf32, #tpu.memory_space<vmem>>, vector<1x32xf32>
      tpu.vector_store %arg6[%c1_32, %c0_33], %54 {strides = array<i32>} : memref<2x32xf32, #tpu.memory_space<vmem>>, vector<1x32xf32>,
    } else {
    }
    return
  }
  func.func @transform_0(%arg0: i32) -> (i32, i32) {
    %c0_i32 = arith.constant 0 : i32
    %c0_i32_0 = arith.constant 0 : i32
    return %arg0, %c0_i32 : i32, i32
  }
  func.func @transform_1(%arg0: i32) -> (i32, i32) {
    %c0_i32 = arith.constant 0 : i32
    %c0_i32_0 = arith.constant 0 : i32
    %c0_i32_1 = arith.constant 0 : i32
    return %c0_i32, %c0_i32_0 : i32, i32
  }
  func.func @transform_2(%arg0: i32) -> (i32, i32) {
    %c0_i32 = arith.constant 0 : i32
    %c0_i32_0 = arith.constant 0 : i32
    %c0_i32_1 = arith.constant 0 : i32
    return %c0_i32, %c0_i32_0 : i32, i32
  }
  func.func @transform_3(%arg0: i32) -> (i32, i32) {
    %c0_i32 = arith.constant 0 : i32
    %c0_i32_0 = arith.constant 0 : i32
    %c0_i32_1 = arith.constant 0 : i32
    return %c0_i32, %c0_i32_0 : i32, i32
  }
  func.func @transform_4(%arg0: i32) -> (i32, i32) {
    %c0_i32 = arith.constant 0 : i32
    %c0_i32_0 = arith.constant 0 : i32
    %c0_i32_1 = arith.constant 0 : i32
    return %c0_i32, %c0_i32_0 : i32, i32
  }
  func.func @transform_5(%arg0: i32) -> (i32, i32) {
    %c0_i32 = arith.constant 0 : i32
    %c0_i32_0 = arith.constant 0 : i32
    %c0_i32_1 = arith.constant 0 : i32
    return %c0_i32, %c0_i32_0 : i32, i32
  }
}

</mosaic_0001>

<bundles_post_ra>
// kernel: tpu_custom_call.1
= control target key start
LH: loop header
LB: loop body
LE: loop exit
PB: predicated region body
PF: predicated region fallthrough
CT: control target
= control target key end

     0   :  { %v163_v1 = vmov 0   ;;  %v164_v2 = vmov 2   ;;  %s235_s0 = inlined_call_operand.vmem [shape: f32[8,3], index: 0, kind: input, shape index: {}]   ;;  %s236_s1 = inlined_call_operand.vmem [shape: f32[3,32], index: 1, kind: input, shape index: {}]   ;;  %s237_s2 = inlined_call_operand.vmem [shape: f32[1,32], index: 2, kind: input, shape index: {}]   ;;  %s238_s3 = inlined_call_operand.vmem [shape: f32[1,32], index: 3, kind: input, shape index: {}]   ;;  %s239_s4 = inlined_call_operand.vmem [shape: f32[1,32], index: 4, kind: input, shape index: {}]   ;;  %s240_s5 = inlined_call_operand.hbm [shape: f32[2,32], index: 5, kind: output, shape index: {}]  }
   0x1   :  { %v27_v0 = vld [vmem:[%s235_s0] sm:$0xff]  ;;  %133 = vset.pattern.permute.xlu0 %v163_v1  ;;  %135 = vset.pattern.permute.xlu1 %v164_v2 }
   0x2   :  { %10 = vsyncpa [#allocation4], 0  ;;  %31 = vperm.xlu0 %133, %v27_v0   ;;  %52 = vperm.xlu1 %135, %v27_v0   ;;  %v165_v3 = vmov 1   ;;  %vm25_vm0 = vcmask 254976   ;;  %v166_v4 = vmov 0.0   ;;  %vm70_vm1 = vcmask 261120  }
   0x3   :  { %26 = vst.msk [vmem:[#allocation2] sm:$0x3] %vm25_vm0, %v166_v4  ;;  %v124_v6 = vld [vmem:[%s236_s1] ss:$0 sm:$0xff]  ;;  %v125_v7 = vld [vmem:[%s236_s1 + $0x1] ss:$0 sm:$0xff] }
   0x4   :  { %v126_v8 = vld [vmem:[%s236_s1 + $0x2] ss:$0 sm:$0xff]  ;;  %v127_v15 = vld [vmem:[%s237_s2] ss:$0 sm:$0xff]  ;;  %vm79_vm2 = vcmask 253952   ;;  %s167_s29 = smov [#allocation3]  }
   0x5   :  { %v101_v44 = vld [vmem:[%s238_s3] sm:$0x1]  ;;  %s116_s30 = sshll.u32 %s167_s29, 4  ;;  %s117_s30 = int_to_ptr.vmem [resolvable:$true] %s116_s30 }
   0x6   :  { %134 = vset.pattern.permute.xlu0 %v165_v3  ;;  %v106_v47 = vld [vmem:[%s239_s4] sm:$0x1]  ;;  %s139_s6 = scalar_lea.vmem %s117_s30, 32  ;;  %p144_p1 = scmp.lt.s32.totalorder %s117_s30, %s117_s30 }
   0x7   :  { %41 = vperm.xlu0 %134, %v27_v0   ;;  %p140_p0 = scmp.ne.s32.totalorder %s117_s30, %s139_s6  ;;  %p145_p2 = scmp.lt.s32.totalorder %s139_s6, %s139_s6 }
   0x9   :  { %p146_p3 = por %p145_p2, %p144_p1 }
   0xa   :  { %v69_v30 = vld [vmem:[#allocation2] sm:$0x1]  ;;  %v81_v33 = vld [vmem:[#allocation2 + $0x1] sm:$0x1] }
   0xb   :  { %136 = vset.pattern.permute.xlu0 %v164_v2  ;;  %p147_p4 = pnand %p146_p3, %p140_p0 }
  0x81   :  { %v32_v5 = vpop.permute.xlu0 %31  ;;  %v53_v9 = vpop.permute.xlu1 %52 }
  0x82   :  { %v38_v11 = vmul.f32 %v124_v6, %v32_v5  ;;  %v59_v13 = vmul.f32 %v126_v8, %v53_v9 }
  0x86   :  { %v42_v10 = vpop.permute.xlu0 %41 }
  0x87   :  { %v48_v12 = vmul.f32 %v125_v7, %v42_v10 }
  0x89   :  { %v49_v14 = vadd.f32 %v48_v12, %v38_v11 }
  0x8b   :  { %v60_v16 = vadd.f32 %v59_v13, %v49_v14 }
  0x8d   :  { %v68_v17 = vadd.f32 %v127_v15, %v60_v16 }
  0x8f   :  { %v71_v18 = vsel %vm70_vm1, %v68_v17, 0.0  ;;  %v82_v19 = vmul.f32 %v68_v17, %v68_v17 }
  0x90   :  { %v72_v20 = vrot.slane %v71_v18, 4 }
  0x91   :  { %v83_v21 = vsel %vm70_vm1, %v82_v19, 0.0 }
  0x92   :  { %v73_v22 = vadd.f32 %v72_v20, %v71_v18  ;;  %v84_v23 = vrot.slane %v83_v21, 4 }
  0x94   :  { %v74_v24 = vrot.slane %v73_v22, 2  ;;  %v85_v25 = vadd.f32 %v84_v23, %v83_v21 }
  0x96   :  { %v75_v26 = vadd.f32 %v74_v24, %v73_v22  ;;  %v86_v27 = vrot.slane %v85_v25, 2 }
  0x98   :  { %v76_v28 = vrot.slane %v75_v26, 1  ;;  %v87_v29 = vadd.f32 %v86_v27, %v85_v25 }
  0x9a   :  { %v77_v31 = vadd.f32 %v76_v28, %v75_v26  ;;  %v88_v32 = vrot.slane %v87_v29, 1 }
  0x9c   :  { %v78_v34 = vadd.f32 %v77_v31, %v69_v30  ;;  %v89_v35 = vadd.f32 %v88_v32, %v87_v29 }
  0x9e   :  { %v90_v36 = vadd.f32 %v89_v35, %v81_v33  ;;  %80 = vst.msk [vmem:[#allocation2] sm:$0x1] %vm79_vm2, %v78_v34 }
  0xa0   :  { %91 = vst.msk [vmem:[#allocation2 + $0x1] sm:$0x1] %vm79_vm2, %v90_v36 }
  0xa5   :  { %v95_v37 = vld [vmem:[#allocation2] sm:$0x1] }
  0xa6   :  { %v96_v38 = vmul.f32 0.125, %v95_v37 }
  0xa7   :  { %v97_v39 = vld [vmem:[#allocation2 + $0x1] sm:$0x1] }
  0xa8   :  { %v98_v40 = vmul.f32 0.125, %v97_v39  ;;  %v99_v41 = vmul.f32 %v96_v38, %v96_v38 }
  0xaa   :  { %v100_v42 = vsub.f32 %v98_v40, %v99_v41 }
  0xac   :  { %v102_v43 = vadd.f32 1e-05, %v100_v42 }
  0xae   :  { %137 = vrsqrt.f32 %v102_v43 }
  0xb8   :  { %v138_v45 = vpop.eup %137 }
  0xb9   :  { %v104_v46 = vmul.f32 %v138_v45, %v101_v44 }
  0xbb   :  { %105 = vst.msk [vmem:[#allocation3] sm:$0x1] %vm79_vm2, %v104_v46  ;;  %v107_v48 = vmul.f32 %v104_v46, %v96_v38 }
  0xbd   :  { %v108_v49 = vsub.f32 %v106_v47, %v107_v48 }
  0xbf   :  { %109 = vst.msk [vmem:[#allocation3 + $0x1] sm:$0x1] %vm79_vm2, %v108_v49 }
  0xc0   :  { %150 = shalt.err (!%p147_p4)
}
  0xc1   :  { %s151_s4 = scalar_lea.hbm %s240_s5, 32 }
  0xc2   :  { %p152_p5 = scmp.ne.s32.totalorder %s240_s5, %s151_s4  ;;  %p155_p6 = scmp.lt.u32.totalorder %s151_s4, %s240_s5 }
  0xc4   :  { %p157_p7 = pnand %p155_p6, %p152_p5 }
  0xc6   :  { %160 = shalt.err (!%p157_p7)
}
  0xc7   :  { %119 = dma.vmem_to_hbm [thread:$0]  %s117_s30, 32, %s240_s5, [#allocation4]  }
  0xc8   :  { %161 = dma.done.wait [#allocation4], 32  }
  0xc9   :  { %162 = vsyncadd [#allocation4], 4294967264 }
  0xca   :  { %123 = vsyncpa [#allocation4], 1 }

</bundles_post_ra>
